<compile_context>
chip_gen: v5e
topology: v5e:2x2
jax: 0.10.0
libtpu: 0.0.40
codegen_flags: <defaults>
</compile_context>

<pallas_src>
import jax
import jax.numpy as jnp
from jax.experimental import pallas as pl
from jax.experimental.pallas import tpu as pltpu

LAYER_DIMS = [784, 10, 10, 10]


def _round_up(x, m):
    return ((x + m - 1) // m) * m


def _make_kernel(d1, d2, d3, o1, o2, o3):
    """Build the fused MLP kernel with static output-column offsets."""

    def mlp_kernel(x_ref, w1_ref, w2_ref, w3_ref, out_ref):
        # x_ref: (bm, 784); w*_ref: (in, out); out_ref: (bm, 128) packed slab.
        x = x_ref[...]

        # layers[0]: Linear(784, d1, bias=False)
        h1 = jnp.dot(x, w1_ref[...], preferred_element_type=jnp.float32)

        # layers[1]: ReLU ; layers[2]: Linear(d1, d2, bias=False)
        h2 = jnp.dot(jnp.maximum(h1, 0.0), w2_ref[...],
                     preferred_element_type=jnp.float32)

        # layers[3]: ReLU ; layers[4]: Linear(d2, d3, bias=False) -> network output
        h3 = jnp.dot(jnp.maximum(h2, 0.0), w3_ref[...],
                     preferred_element_type=jnp.float32)

        # One lane-dense output slab; zero padding lanes for determinism, then
        # overwrite the three activation column groups.
        out_ref[...] = jnp.zeros_like(out_ref)
        out_ref[:, o1:o1 + d1] = h1
        out_ref[:, o2:o2 + d2] = h2
        out_ref[:, o3:o3 + d3] = h3

    return mlp_kernel


def mlp_forward(x, w1, w2, w3, *, bm=1024, use_bf16=False):
    """x: (B, 784). w1:(10,784), w2:(10,10), w3:(10,10) in PyTorch (out, in) layout.

    Returns (output, activations) where activations mirrors the PyTorch forward
    hooks on layers[0], layers[2], layers[4] (pre-ReLU linear outputs).
    """
    B, D_in = x.shape
    d1, d2, d3 = w1.shape[0], w2.shape[0], w3.shape[0]

    # Packed-slab column offsets (lane-dense output, width padded to 128).
    o1 = 0
    o2 = _round_up(d1, 16)
    o3 = o2 + _round_up(d2, 16)
    slab_w = _round_up(max(o3 + d3, 128), 128)

    # Fixed batch tile: multiple of 8, clamped so tiny batches don't over-pad.
    bm = max(8, min(_round_up(bm, 8), _round_up(B, 8)))
    n_steps = pl.cdiv(B, bm)
    B_pad = n_steps * bm

    # Glue: f32 cast, zero-pad ragged batch, pre-transpose weights to (in, out).
    x = jnp.asarray(x, jnp.float32)
    if B_pad != B:
        x = jnp.pad(x, ((0, B_pad - B), (0, 0)))
    w1t = jnp.asarray(w1, jnp.float32).T
    w2t = jnp.asarray(w2, jnp.float32).T
    w3t = jnp.asarray(w3, jnp.float32).T

    if use_bf16:
        # Halve HBM traffic for the dominant x stream; f32 MXU accumulation.
        x = x.astype(jnp.bfloat16)
        w1t = w1t.astype(jnp.bfloat16)

    weight_bytes = (w1t.size * w1t.dtype.itemsize
                    + w2t.size * w2t.dtype.itemsize
                    + w3t.size * w3t.dtype.itemsize)
    cost = pl.CostEstimate(
        flops=2 * B_pad * (D_in * d1 + d1 * d2 + d2 * d3),
        transcendentals=0,
        bytes_accessed=int(x.size * x.dtype.itemsize
                           + B_pad * slab_w * 4
                           + weight_bytes),
    )

    slab = pl.pallas_call(
        _make_kernel(d1, d2, d3, o1, o2, o3),
        out_shape=jax.ShapeDtypeStruct((B_pad, slab_w), jnp.float32),
        grid_spec=pltpu.PrefetchScalarGridSpec(
            num_scalar_prefetch=0,
            grid=(n_steps,),
            in_specs=[
                pl.BlockSpec((bm, D_in), lambda i: (i, 0)),   # streamed x tiles
                pl.BlockSpec((D_in, d1), lambda i: (0, 0)),   # resident weights
                pl.BlockSpec((d1, d2), lambda i: (0, 0)),
                pl.BlockSpec((d2, d3), lambda i: (0, 0)),
            ],
            out_specs=pl.BlockSpec((bm, slab_w), lambda i: (i, 0)),
        ),
        compiler_params=pltpu.CompilerParams(
            dimension_semantics=("parallel",),
            vmem_limit_bytes=32 * 1024 * 1024,
        ),
        cost_estimate=cost,
    )(x, w1t, w2t, w3t)

    a1 = slab[:B, o1:o1 + d1]
    a2 = slab[:B, o2:o2 + d2]
    a3 = slab[:B, o3:o3 + d3]
    return a3, {"layers[0]": a1, "layers[2]": a2, "layers[4]": a3}


def init_params(key, layer_dims):
    """Deterministic init mimicking nn.Linear default (U[-1/sqrt(in), 1/sqrt(in)])."""
    params = []
    for i in range(1, len(layer_dims)):
        key, sub = jax.random.split(key)
        fan_in = layer_dims[i - 1]
        bound = 1.0 / (fan_in ** 0.5)
        w = jax.random.uniform(
            sub, (layer_dims[i], fan_in), jnp.float32, -bound, bound)
        params.append(w)
    return params


def reference_forward(x, w1, w2, w3):
    h = jnp.maximum(x @ w1.T, 0.0)
    h = jnp.maximum(h @ w2.T, 0.0)
    return h @ w3.T


if __name__ == "__main__":
    key = jax.random.PRNGKey(0)
    key, kx = jax.random.split(key)

    B = 8
    x = jax.random.normal(kx, (B, LAYER_DIMS[0]), jnp.float32)
    w1, w2, w3 = init_params(key, LAYER_DIMS)

    out, acts = mlp_forward(x, w1, w2, w3)
    out = jax.block_until_ready(out)

    ref = reference_forward(x, w1, w2, w3)
    assert out.shape == (B, LAYER_DIMS[-1])
    assert jnp.allclose(out, ref, atol=1e-4, rtol=1e-4)

    # Hook activations (pre-ReLU linear outputs of layers[0]/[2]/[4]).
    h1_ref = x @ w1.T
    h2_ref = jnp.maximum(h1_ref, 0.0) @ w2.T
    assert jnp.allclose(acts["layers[0]"], h1_ref, atol=1e-4, rtol=1e-4)
    assert jnp.allclose(acts["layers[2]"], h2_ref, atol=1e-4, rtol=1e-4)
    assert jnp.allclose(acts["layers[4]"], out)

    # Ragged batch + multi-step pipelined grid path (B not a multiple of bm).
    key, kx2 = jax.random.split(key)
    B2 = 272
    x2 = jax.random.normal(kx2, (B2, LAYER_DIMS[0]), jnp.float32)
    out2, _ = mlp_forward(x2, w1, w2, w3, bm=128)
    out2 = jax.block_until_ready(out2)
    ref2 = reference_forward(x2, w1, w2, w3)
    assert out2.shape == (B2, LAYER_DIMS[-1])
    assert jnp.allclose(out2, ref2, atol=1e-4, rtol=1e-4)

    print("KERNEL_OK")
</pallas_src>

<mosaic_0001>
module attributes {stable_mosaic.version = 11 : i64} {
  func.func @mlp_kernel(%arg0: i32, %arg1: memref<8x784xf32, #tpu.memory_space<vmem>>, %arg2: memref<784x10xf32, #tpu.memory_space<vmem>>, %arg3: memref<10x10xf32, #tpu.memory_space<vmem>>, %arg4: memref<10x10xf32, #tpu.memory_space<vmem>>, %arg5: memref<8x128xf32, #tpu.memory_space<vmem>>) attributes {dimension_semantics = [#tpu.dimension_semantics<parallel>], iteration_bounds = array<i64: 1>, scalar_prefetch = 0 : i64, scratch_operands = 0 : i64, tpu.core_type = #tpu.core_type<tc>, window_params = [{transform_indices = @transform_0, window_bounds = array<i64: 8, 784>}, {pipeline_mode = #tpu.pipeline_mode<synchronous>, transform_indices = @transform_1, window_bounds = array<i64: 784, 10>}, {pipeline_mode = #tpu.pipeline_mode<synchronous>, transform_indices = @transform_2, window_bounds = array<i64: 10, 10>}, {pipeline_mode = #tpu.pipeline_mode<synchronous>, transform_indices = @transform_3, window_bounds = array<i64: 10, 10>}, {transform_indices = @transform_4, window_bounds = array<i64: 8, 128>}]} {
    %c0 = arith.constant 0 : index
    %c0_0 = arith.constant 0 : index
    %0 = vector.load %arg1[%c0, %c0_0] : memref<8x784xf32, #tpu.memory_space<vmem>>, vector<8x784xf32>
    %c0_1 = arith.constant 0 : index
    %c0_2 = arith.constant 0 : index
    %1 = vector.load %arg2[%c0_1, %c0_2] : memref<784x10xf32, #tpu.memory_space<vmem>>, vector<784x10xf32>
    %cst = arith.constant dense<0.000000e+00> : vector<8x10xf32>
    %2 = tpu.matmul %0, %1, %cst {dimension_numbers = #tpu.dot_dimension_numbers<[1], [0], [0], [1], [0, 0, 1, 1], [], []>} : vector<8x784xf32>, vector<784x10xf32>, vector<8x10xf32> -> vector<8x10xf32>
    %cst_3 = arith.constant 0.000000e+00 : f32
    %3 = vector.broadcast %cst_3 : f32 to vector<8x10xf32>
    %4 = arith.maximumf %2, %3 : vector<8x10xf32>
    %c0_4 = arith.constant 0 : index
    %c0_5 = arith.constant 0 : index
    %5 = vector.load %arg3[%c0_4, %c0_5] : memref<10x10xf32, #tpu.memory_space<vmem>>, vector<10x10xf32>
    %cst_6 = arith.constant dense<0.000000e+00> : vector<8x10xf32>
    %6 = tpu.matmul %4, %5, %cst_6 {dimension_numbers = #tpu.dot_dimension_numbers<[1], [0], [0], [1], [0, 0, 1, 1], [], []>} : vector<8x10xf32>, vector<10x10xf32>, vector<8x10xf32> -> vector<8x10xf32>
    %cst_7 = arith.constant 0.000000e+00 : f32
    %7 = vector.broadcast %cst_7 : f32 to vector<8x10xf32>
    %8 = arith.maximumf %6, %7 : vector<8x10xf32>
    %c0_8 = arith.constant 0 : index
    %c0_9 = arith.constant 0 : index
    %9 = vector.load %arg4[%c0_8, %c0_9] : memref<10x10xf32, #tpu.memory_space<vmem>>, vector<10x10xf32>
    %cst_10 = arith.constant dense<0.000000e+00> : vector<8x10xf32>
    %10 = tpu.matmul %8, %9, %cst_10 {dimension_numbers = #tpu.dot_dimension_numbers<[1], [0], [0], [1], [0, 0, 1, 1], [], []>} : vector<8x10xf32>, vector<10x10xf32>, vector<8x10xf32> -> vector<8x10xf32>
    %cst_11 = arith.constant 0.000000e+00 : f32
    %11 = vector.broadcast %cst_11 : f32 to vector<8x128xf32>
    %c0_12 = arith.constant 0 : index
    %c0_13 = arith.constant 0 : index
    %12 = vector.load %arg5[%c0_12, %c0_13] : memref<8x128xf32, #tpu.memory_space<vmem>>, vector<8x128xf32>
    tpu.vector_store %arg5[%c0_12, %c0_13], %11 {strides = array<i32>} : memref<8x128xf32, #tpu.memory_space<vmem>>, vector<8x128xf32>,
    %c0_14 = arith.constant 0 : index
    %c0_15 = arith.constant 0 : index
    %13 = vector.load %arg5[%c0_14, %c0_15] : memref<8x128xf32, #tpu.memory_space<vmem>>, vector<8x10xf32>
    tpu.vector_store %arg5[%c0_14, %c0_15], %2 {strides = array<i32>} : memref<8x128xf32, #tpu.memory_space<vmem>>, vector<8x10xf32>,
    %c0_16 = arith.constant 0 : index
    %c16 = arith.constant 16 : index
    %14 = vector.load %arg5[%c0_16, %c16] : memref<8x128xf32, #tpu.memory_space<vmem>>, vector<8x10xf32>
    tpu.vector_store %arg5[%c0_16, %c16], %6 {strides = array<i32>} : memref<8x128xf32, #tpu.memory_space<vmem>>, vector<8x10xf32>,
    %c0_17 = arith.constant 0 : index
    %c32 = arith.constant 32 : index
    %15 = vector.load %arg5[%c0_17, %c32] : memref<8x128xf32, #tpu.memory_space<vmem>>, vector<8x10xf32>
    tpu.vector_store %arg5[%c0_17, %c32], %10 {strides = array<i32>} : memref<8x128xf32, #tpu.memory_space<vmem>>, vector<8x10xf32>,
    return
  }
  func.func @transform_0(%arg0: i32) -> (i32, i32) {
    %c0_i32 = arith.constant 0 : i32
    %c0_i32_0 = arith.constant 0 : i32
    return %arg0, %c0_i32 : i32, i32
  }
  func.func @transform_1(%arg0: i32) -> (i32, i32) {
    %c0_i32 = arith.constant 0 : i32
    %c0_i32_0 = arith.constant 0 : i32
    %c0_i32_1 = arith.constant 0 : i32
    return %c0_i32, %c0_i32_0 : i32, i32
  }
  func.func @transform_2(%arg0: i32) -> (i32, i32) {
    %c0_i32 = arith.constant 0 : i32
    %c0_i32_0 = arith.constant 0 : i32
    %c0_i32_1 = arith.constant 0 : i32
    return %c0_i32, %c0_i32_0 : i32, i32
  }
  func.func @transform_3(%arg0: i32) -> (i32, i32) {
    %c0_i32 = arith.constant 0 : i32
    %c0_i32_0 = arith.constant 0 : i32
    %c0_i32_1 = arith.constant 0 : i32
    return %c0_i32, %c0_i32_0 : i32, i32
  }
  func.func @transform_4(%arg0: i32) -> (i32, i32) {
    %c0_i32 = arith.constant 0 : i32
    %c0_i32_0 = arith.constant 0 : i32
    return %arg0, %c0_i32 : i32, i32
  }
}

</mosaic_0001>

<bundles_post_ra>
// kernel: tpu_custom_call.1
= control target key start
LH: loop header
LB: loop body
LE: loop exit
PB: predicated region body
PF: predicated region fallthrough
CT: control target
= control target key end

     0   :  { %s751_s0 = inlined_call_operand.vmem [shape: f32[8,784], index: 0, kind: input, shape index: {}]   ;;  %s752_s1 = inlined_call_operand.vmem [shape: f32[784,10], index: 1, kind: input, shape index: {}]   ;;  %s753_s2 = inlined_call_operand.vmem [shape: f32[10,10], index: 2, kind: input, shape index: {}]   ;;  %s754_s3 = inlined_call_operand.vmem [shape: f32[10,10], index: 3, kind: input, shape index: {}]   ;;  %s755_s4 = inlined_call_operand.hbm [shape: f32[8,128], index: 4, kind: output, shape index: {}]  }
   0x1   :  { %v40_v0 = vld [vmem:[%s752_s1 + $0x78] sm:$0xff]  ;;  %v39_v1 = vld [vmem:[%s752_s1 + $0x70] sm:$0xff]  ;;  %v38_v4 = vld [vmem:[%s752_s1 + $0x68] sm:$0xff] }
   0x2   :  { %v56_v2 = vld [vmem:[%s752_s1 + $0xf8] sm:$0xff]  ;;  %127 = vmatpush.msra.mxu0 %v40_v0  ;;  %v55_v3 = vld [vmem:[%s752_s1 + $0xf0] sm:$0xff]  ;;  %v54_v5 = vld [vmem:[%s752_s1 + $0xe8] sm:$0xff] }
   0x3   :  { %147 = vmatpush.msra.mxu1 %v56_v2  ;;  %v37_v6 = vld [vmem:[%s752_s1 + $0x60] sm:$0xff]  ;;  %v36_v8 = vld [vmem:[%s752_s1 + $0x58] sm:$0xff]  ;;  %v71_v11 = vld [vmem:[%s752_s1 + $0x170] sm:$0xff] }
   0x4   :  { %128 = vmatpush.msra.mxu0 %v39_v1  ;;  %v53_v7 = vld [vmem:[%s752_s1 + $0xe0] sm:$0xff]  ;;  %v52_v9 = vld [vmem:[%s752_s1 + $0xd8] sm:$0xff]  ;;  %v35_v13 = vld [vmem:[%s752_s1 + $0x50] sm:$0xff] }
   0x5   :  { %148 = vmatpush.msra.mxu1 %v55_v3  ;;  %v72_v10 = vld [vmem:[%s752_s1 + $0x178] sm:$0xff]  ;;  %v51_v14 = vld [vmem:[%s752_s1 + $0xd0] sm:$0xff]  ;;  %v70_v15 = vld [vmem:[%s752_s1 + $0x168] sm:$0xff] }
   0x6   :  { %129 = vmatpush.msra.mxu0 %v38_v4  ;;  %v88_v12 = vld [vmem:[%s752_s1 + $0x1f8] sm:$0xff]  ;;  %167 = vmatpush.msra.mxu2 %v72_v10  ;;  %v87_v16 = vld [vmem:[%s752_s1 + $0x1f0] sm:$0xff]  ;;  %v34_v17 = vld [vmem:[%s752_s1 + $0x48] sm:$0xff] }
   0x7   :  { %149 = vmatpush.msra.mxu1 %v54_v5  ;;  %187 = vmatpush.msra.mxu3 %v88_v12  ;;  %v50_v18 = vld [vmem:[%s752_s1 + $0xc8] sm:$0xff]  ;;  %v69_v20 = vld [vmem:[%s752_s1 + $0x160] sm:$0xff]  ;;  %v68_v24 = vld [vmem:[%s752_s1 + $0x158] sm:$0xff] }
   0x8   :  { %130 = vmatpush.msra.mxu0 %v37_v6  ;;  %168 = vmatpush.msra.mxu2 %v71_v11  ;;  %v86_v19 = vld [vmem:[%s752_s1 + $0x1e8] sm:$0xff]  ;;  %v85_v21 = vld [vmem:[%s752_s1 + $0x1e0] sm:$0xff]  ;;  %v84_v25 = vld [vmem:[%s752_s1 + $0x1d8] sm:$0xff] }
   0x9   :  { %150 = vmatpush.msra.mxu1 %v53_v7  ;;  %188 = vmatpush.msra.mxu3 %v87_v16  ;;  %v33_v22 = vld [vmem:[%s752_s1 + $0x40] sm:$0xff]  ;;  %v32_v26 = vld [vmem:[%s752_s1 + $0x38] sm:$0xff]  ;;  %v67_v28 = vld [vmem:[%s752_s1 + $0x150] sm:$0xff] }
   0xa   :  { %131 = vmatpush.msra.mxu0 %v36_v8  ;;  %v49_v23 = vld [vmem:[%s752_s1 + $0xc0] sm:$0xff]  ;;  %169 = vmatpush.msra.mxu2 %v70_v15  ;;  %v48_v27 = vld [vmem:[%s752_s1 + $0xb8] sm:$0xff]  ;;  %v83_v29 = vld [vmem:[%s752_s1 + $0x1d0] sm:$0xff] }
   0xb   :  { %151 = vmatpush.msra.mxu1 %v52_v9  ;;  %189 = vmatpush.msra.mxu3 %v86_v19  ;;  %v31_v30 = vld [vmem:[%s752_s1 + $0x30] sm:$0xff]  ;;  %v66_v32 = vld [vmem:[%s752_s1 + $0x148] sm:$0xff]  ;;  %v65_v36 = vld [vmem:[%s752_s1 + $0x140] sm:$0xff] }
   0xc   :  { %132 = vmatpush.msra.mxu0 %v35_v13  ;;  %170 = vmatpush.msra.mxu2 %v69_v20  ;;  %v47_v31 = vld [vmem:[%s752_s1 + $0xb0] sm:$0xff]  ;;  %v82_v33 = vld [vmem:[%s752_s1 + $0x1c8] sm:$0xff]  ;;  %v81_v37 = vld [vmem:[%s752_s1 + $0x1c0] sm:$0xff] }
   0xd   :  { %152 = vmatpush.msra.mxu1 %v51_v14  ;;  %190 = vmatpush.msra.mxu3 %v85_v21  ;;  %v30_v34 = vld [vmem:[%s752_s1 + $0x28] sm:$0xff]  ;;  %v29_v38 = vld [vmem:[%s752_s1 + $0x20] sm:$0xff]  ;;  %v64_v40 = vld [vmem:[%s752_s1 + $0x138] sm:$0xff] }
   0xe   :  { %133 = vmatpush.msra.mxu0 %v34_v17  ;;  %171 = vmatpush.msra.mxu2 %v68_v24  ;;  %v46_v35 = vld [vmem:[%s752_s1 + $0xa8] sm:$0xff]  ;;  %v45_v39 = vld [vmem:[%s752_s1 + $0xa0] sm:$0xff]  ;;  %v80_v41 = vld [vmem:[%s752_s1 + $0x1b8] sm:$0xff] }
   0xf   :  { %153 = vmatpush.msra.mxu1 %v50_v18  ;;  %191 = vmatpush.msra.mxu3 %v84_v25  ;;  %v28_v42 = vld [vmem:[%s752_s1 + $0x18] sm:$0xff]  ;;  %v63_v44 = vld [vmem:[%s752_s1 + $0x130] sm:$0xff]  ;;  %v62_v48 = vld [vmem:[%s752_s1 + $0x128] sm:$0xff] }
  0x10   :  { %134 = vmatpush.msra.mxu0 %v33_v22  ;;  %172 = vmatpush.msra.mxu2 %v67_v28  ;;  %v44_v43 = vld [vmem:[%s752_s1 + $0x98] sm:$0xff]  ;;  %v79_v45 = vld [vmem:[%s752_s1 + $0x1b0] sm:$0xff]  ;;  %v78_v49 = vld [vmem:[%s752_s1 + $0x1a8] sm:$0xff] }
  0x11   :  { %154 = vmatpush.msra.mxu1 %v49_v23  ;;  %192 = vmatpush.msra.mxu3 %v83_v29  ;;  %v27_v46 = vld [vmem:[%s752_s1 + $0x10] sm:$0xff]  ;;  %v26_v50 = vld [vmem:[%s752_s1 + $0x8] sm:$0xff]  ;;  %v61_v52 = vld [vmem:[%s752_s1 + $0x120] sm:$0xff] }
  0x12   :  { %135 = vmatpush.msra.mxu0 %v32_v26  ;;  %173 = vmatpush.msra.mxu2 %v66_v32  ;;  %v43_v47 = vld [vmem:[%s752_s1 + $0x90] sm:$0xff]  ;;  %v42_v51 = vld [vmem:[%s752_s1 + $0x88] sm:$0xff]  ;;  %v77_v53 = vld [vmem:[%s752_s1 + $0x1a0] sm:$0xff] }
  0x13   :  { %155 = vmatpush.msra.mxu1 %v48_v27  ;;  %193 = vmatpush.msra.mxu3 %v82_v33  ;;  %v25_v54 = vld [vmem:[%s752_s1] sm:$0xff]  ;;  %v104_v56 = vld [vmem:[%s752_s1 + $0x278] sm:$0xff]  ;;  %v103_v60 = vld [vmem:[%s752_s1 + $0x270] sm:$0xff] }
  0x14   :  { %136 = vmatpush.msra.mxu0 %v31_v30  ;;  %174 = vmatpush.msra.mxu2 %v65_v36  ;;  %v41_v55 = vld [vmem:[%s752_s1 + $0x80] sm:$0xff]  ;;  %v120_v57 = vld [vmem:[%s752_s1 + $0x2f8] sm:$0xff]  ;;  %v119_v61 = vld [vmem:[%s752_s1 + $0x2f0] sm:$0xff] }
  0x15   :  { %156 = vmatpush.msra.mxu1 %v47_v31  ;;  %194 = vmatpush.msra.mxu3 %v81_v37  ;;  %v60_v58 = vld [vmem:[%s752_s1 + $0x118] sm:$0xff]  ;;  %v59_v62 = vld [vmem:[%s752_s1 + $0x110] sm:$0xff]  ;;  %v102_v0 = vld [vmem:[%s752_s1 + $0x268] sm:$0xff] }
  0x16   :  { %137 = vmatpush.msra.mxu0 %v30_v34  ;;  %175 = vmatpush.msra.mxu2 %v64_v40  ;;  %v76_v59 = vld [vmem:[%s752_s1 + $0x198] sm:$0xff]  ;;  %v75_v63 = vld [vmem:[%s752_s1 + $0x190] sm:$0xff]  ;;  %v118_v1 = vld [vmem:[%s752_s1 + $0x2e8] sm:$0xff] }
  0x17   :  { %157 = vmatpush.msra.mxu1 %v46_v35  ;;  %195 = vmatpush.msra.mxu3 %v80_v41  ;;  %v58_v2 = vld [vmem:[%s752_s1 + $0x108] sm:$0xff]  ;;  %v101_v4 = vld [vmem:[%s752_s1 + $0x260] sm:$0xff] }
  0x18   :  { %138 = vmatpush.msra.mxu0 %v29_v38  ;;  %176 = vmatpush.msra.mxu2 %v63_v44  ;;  %v74_v3 = vld [vmem:[%s752_s1 + $0x188] sm:$0xff]  ;;  %v117_v5 = vld [vmem:[%s752_s1 + $0x2e0] sm:$0xff] }
  0x19   :  { %158 = vmatpush.msra.mxu1 %v45_v39  ;;  %196 = vmatpush.msra.mxu3 %v79_v45 }
  0x1a   :  { %139 = vmatpush.msra.mxu0 %v28_v42  ;;  %177 = vmatpush.msra.mxu2 %v62_v48 }
  0x1b   :  { %159 = vmatpush.msra.mxu1 %v44_v43  ;;  %197 = vmatpush.msra.mxu3 %v78_v49 }
  0x1c   :  { %140 = vmatpush.msra.mxu0 %v27_v46  ;;  %178 = vmatpush.msra.mxu2 %v61_v52 }
  0x1d   :  { %160 = vmatpush.msra.mxu1 %v43_v47  ;;  %198 = vmatpush.msra.mxu3 %v77_v53 }
  0x1e   :  { %141 = vmatpush.msra.mxu0 %v26_v50  ;;  %179 = vmatpush.msra.mxu2 %v60_v58 }
  0x1f   :  { %161 = vmatpush.msra.mxu1 %v42_v51  ;;  %199 = vmatpush.msra.mxu3 %v76_v59 }
  0x20   :  { %142 = vmatpush.msra.mxu0 %v25_v54  ;;  %180 = vmatpush.msra.mxu2 %v59_v62 }
  0x21   :  { %162 = vmatpush.msra.mxu1 %v41_v55  ;;  %200 = vmatpush.msra.mxu3 %v75_v63 }
  0x22   :  { %207 = vmatpush.msrb.mxu0 %v104_v56 }
  0x23   :  { %227 = vmatpush.msrb.mxu1 %v120_v57 }
  0x24   :  { %208 = vmatpush.msrb.mxu0 %v103_v60 }
  0x25   :  { %228 = vmatpush.msrb.mxu1 %v119_v61 }
  0x26   :  { %9 = vsyncpa [#allocation3], 0  ;;  %209 = vmatpush.msrb.mxu0 %v102_v0  ;;  %v57_v6 = vld [vmem:[%s752_s1 + $0x100] sm:$0xff]  ;;  %v100_v8 = vld [vmem:[%s752_s1 + $0x258] sm:$0xff]  ;;  %181 = vmatpush.msra.mxu2 %v58_v2  ;;  %vm123_vm0 = vcmask 130048   ;;  %vm274_vm1 = vcmask 1041408  }
  0x27   :  { %229 = vmatpush.msrb.mxu1 %v118_v1  ;;  %v73_v7 = vld [vmem:[%s752_s1 + $0x180] sm:$0xff]  ;;  %v116_v9 = vld [vmem:[%s752_s1 + $0x2d8] sm:$0xff]  ;;  %201 = vmatpush.msra.mxu3 %v74_v3  ;;  %v20_v10 = vld [vmem:[%s751_s0 + $0x10] sm:$0xff]  ;;  %v392_v42 = vmov 0.0   ;;  %vm270_vm2 = vcmask 80896   ;;  %vm333_vm3 = vcmask 212096  }
  0x28   :  { %210 = vmatpush.msrb.mxu0 %v101_v4  ;;  %v21_v11 = vld [vmem:[%s751_s0 + $0x18] sm:$0xff]  ;;  %v99_v12 = vld [vmem:[%s752_s1 + $0x250] sm:$0xff]  ;;  %182 = vmatpush.msra.mxu2 %v57_v6  ;;  %v122_v14 = vld [vmem:[%s752_s1 + $0x308] sm:$0xff]  ;;  %327 = vst [vmem:[#allocation2] sm:$0xff] %v392_v42  ;;  %s395_s23 = smov [#allocation2]   ;;  %s348_s27 = sshll.u32 %s755_s4, 4  ;;  %s349_s27 = int_to_ptr.hbm [resolvable:$true] %s348_s27 }
  0x29   :  { %230 = vmatpush.msrb.mxu1 %v117_v5  ;;  %v115_v13 = vld [vmem:[%s752_s1 + $0x2d0] sm:$0xff]  ;;  %202 = vmatpush.msra.mxu3 %v73_v7  ;;  %v18_v15 = vld [vmem:[%s751_s0] sm:$0xff]  ;;  %v98_v16 = vld [vmem:[%s752_s1 + $0x248] sm:$0xff]  ;;  %s346_s24 = sshll.u32 %s395_s23, 4  ;;  %vm339_vm4 = vcmask 343296   ;;  %s347_s24 = int_to_ptr.vmem [resolvable:$true] %s346_s24 }
  0x2a   :  { %211 = vmatpush.msrb.mxu0 %v100_v8  ;;  %v114_v17 = vld [vmem:[%s752_s1 + $0x2c8] sm:$0xff]  ;;  %183 = vmatmul.f32.vlgmr.msra.gmra.mxu2 %v20_v10  ;;  %v121_v19 = vld [vmem:[%s752_s1 + $0x300] sm:$0xff]  ;;  %v96_v22 = vld [vmem:[%s752_s1 + $0x238] sm:$0xff] }
  0x2b   :  { %231 = vmatpush.msrb.mxu1 %v116_v9  ;;  %203 = vmatmul.f32.vlgmr.msra.gmra.mxu3 %v21_v11  ;;  %v19_v18 = vld [vmem:[%s751_s0 + $0x8] sm:$0xff]  ;;  %v97_v20 = vld [vmem:[%s752_s1 + $0x240] sm:$0xff]  ;;  %v112_v23 = vld [vmem:[%s752_s1 + $0x2b8] sm:$0xff] }
  0x2c   :  { %212 = vmatpush.msrb.mxu0 %v99_v12  ;;  %v113_v21 = vld [vmem:[%s752_s1 + $0x2c0] sm:$0xff]  ;;  %261 = vmatpush.msrb.mxu2 %v122_v14  ;;  %v24_v24 = vld [vmem:[%s751_s0 + $0x30] sm:$0xff]  ;;  %v94_v27 = vld [vmem:[%s752_s1 + $0x228] sm:$0xff] }
  0x2d   :  { %232 = vmatpush.msrb.mxu1 %v115_v13  ;;  %143 = vmatmul.f32.vlgmr.msra.gmra.mxu0 %v18_v15  ;;  %v95_v25 = vld [vmem:[%s752_s1 + $0x230] sm:$0xff]  ;;  %v110_v28 = vld [vmem:[%s752_s1 + $0x2a8] sm:$0xff]  ;;  %v93_v29 = vld [vmem:[%s752_s1 + $0x220] sm:$0xff] }
  0x2e   :  { %213 = vmatpush.msrb.mxu0 %v98_v16  ;;  %163 = vmatmul.f32.vlgmr.msra.gmra.mxu1 %v19_v18  ;;  %v111_v26 = vld [vmem:[%s752_s1 + $0x2b0] sm:$0xff]  ;;  %v109_v30 = vld [vmem:[%s752_s1 + $0x2a0] sm:$0xff]  ;;  %v92_v31 = vld [vmem:[%s752_s1 + $0x218] sm:$0xff] }
  0x2f   :  { %233 = vmatpush.msrb.mxu1 %v114_v17  ;;  %262 = vmatpush.msrb.mxu2 %v121_v19  ;;  %v108_v32 = vld [vmem:[%s752_s1 + $0x298] sm:$0xff]  ;;  %v91_v33 = vld [vmem:[%s752_s1 + $0x210] sm:$0xff]  ;;  %v90_v35 = vld [vmem:[%s752_s1 + $0x208] sm:$0xff] }
  0x30   :  { %214 = vmatpush.msrb.mxu0 %v97_v20  ;;  %v107_v34 = vld [vmem:[%s752_s1 + $0x290] sm:$0xff]  ;;  %v106_v36 = vld [vmem:[%s752_s1 + $0x288] sm:$0xff]  ;;  %v89_v37 = vld [vmem:[%s752_s1 + $0x200] sm:$0xff] }
  0x31   :  { %234 = vmatpush.msrb.mxu1 %v113_v21  ;;  %v105_v38 = vld [vmem:[%s752_s1 + $0x280] sm:$0xff]  ;;  %v23_v40 = vld [vmem:[%s751_s0 + $0x28] sm:$0xff] }
  0x32   :  { %215 = vmatpush.msrb.mxu0 %v96_v22  ;;  %357 = vmatmul.msk.f32.vlgmr.msrb.gmra.mxu2 %vm123_vm0, %v24_v24  ;;  %v22_v39 = vld [vmem:[%s751_s0 + $0x20] sm:$0xff]  ;;  %v269_v41 = vld [vmem:[%s753_s2 + $0x8] sm:$0x3] }
  0x33   :  { %235 = vmatpush.msrb.mxu1 %v112_v23  ;;  %358 = vmatpush.msk.msrb.mxu3 %vm274_vm1, %v269_v41  ;;  %v268_v43 = vld [vmem:[%s753_s2] sm:$0xff]  ;;  %v300_v44 = vld [vmem:[%s754_s3 + $0x8] sm:$0x3]  ;;  %s393_s2 = smov 16  }
  0x34   :  { %216 = vmatpush.msrb.mxu0 %v95_v25  ;;  %v299_v45 = vld [vmem:[%s754_s3] sm:$0xff]  ;;  %360 = vmatpush.msk.msra.mxu2 %vm274_vm1, %v300_v44  ;;  %s394_s3 = smov 32  }
  0x35   :  { %236 = vmatpush.msrb.mxu1 %v111_v26  ;;  %293 = vmatpush.msrb.mxu3 %v268_v43 }
  0x36   :  { %217 = vmatpush.msrb.mxu0 %v94_v27  ;;  %322 = vmatpush.msra.mxu2 %v299_v45 }
  0x37   :  { %237 = vmatpush.msrb.mxu1 %v110_v28 }
  0x38   :  { %218 = vmatpush.msrb.mxu0 %v93_v29 }
  0x39   :  { %238 = vmatpush.msrb.mxu1 %v109_v30 }
  0x3a   :  { %219 = vmatpush.msrb.mxu0 %v92_v31 }
  0x3b   :  { %239 = vmatpush.msrb.mxu1 %v108_v32 }
  0x3c   :  { %220 = vmatpush.msrb.mxu0 %v91_v33 }
  0x3d   :  { %240 = vmatpush.msrb.mxu1 %v107_v34 }
  0x3e   :  { %221 = vmatpush.msrb.mxu0 %v90_v35 }
  0x3f   :  { %241 = vmatpush.msrb.mxu1 %v106_v36 }
  0x40   :  { %222 = vmatpush.msrb.mxu0 %v89_v37 }
  0x41   :  { %242 = vmatpush.msrb.mxu1 %v105_v38  ;;  %223 = vmatmul.f32.vlgmr.msrb.gmra.mxu0 %v22_v39 }
  0x42   :  { %243 = vmatmul.f32.vlgmr.msrb.gmra.mxu1 %v23_v40 }
  0xaa   :  { %v144_v46 = vpop.f32.mrf.mxu0 }
  0xab   :  { %v164_v47 = vpop.f32.mrf.mxu1 }
  0xac   :  { %v165_v48 = vadd.f32 %v164_v47, %v144_v46 }
  0xad   :  { %v184_v49 = vpop.f32.mrf.mxu2 }
  0xae   :  { %v185_v50 = vadd.f32 %v184_v49, %v165_v48  ;;  %v204_v51 = vpop.f32.mrf.mxu3 }
  0xb0   :  { %v205_v52 = vadd.f32 %v204_v51, %v185_v50 }
  0xb5   :  { %v264_v56 = vpop.f32.mrf.mxu2 }
  0xbe   :  { %v224_v53 = vpop.f32.mrf.mxu0 }
  0xbf   :  { %v244_v54 = vpop.f32.mrf.mxu1  ;;  %v225_v55 = vadd.f32 %v224_v53, %v205_v52 }
  0xc1   :  { %v245_v57 = vadd.f32 %v244_v54, %v225_v55 }
  0xc3   :  { %v265_v58 = vadd.f32 %v264_v56, %v245_v57 }
  0xc5   :  { %v267_v59 = vmax.f32 %v265_v58, 0.0  ;;  %328 = vst.msk [vmem:[#allocation2] sm:$0xff] %vm270_vm2, %v265_v58 }
  0xc7   :  { %359 = vmatmul.msk.f32.vlgmr.msrb.gmra.mxu3 %vm270_vm2, %v267_v59 }
 0x14a   :  { %v295_v60 = vpop.f32.mrf.mxu3 }
 0x14b   :  { %v298_v61 = vmax.f32 %v295_v60, 0.0  ;;  %330 = vrot.lane.b32.xlu0 %v295_v60, %s393_s2 }
 0x14d   :  { %361 = vmatmul.msk.f32.vlgmr.msra.gmra.mxu2 %vm270_vm2, %v298_v61 }
 0x1bd   :  { %v331_v62 = vpop.permute.xlu0 %330 }
 0x1be   :  { %334 = vst.msk [vmem:[#allocation2] sm:$0xff] %vm333_vm3, %v331_v62 }
 0x1d0   :  { %v324_v63 = vpop.f32.mrf.mxu2 }
 0x1d1   :  { %336 = vrot.lane.b32.xlu0 %v324_v63, %s394_s3 }
 0x243   :  { %v337_v0 = vpop.permute.xlu0 %336 }
 0x244   :  { %340 = vst.msk [vmem:[#allocation2] sm:$0xff] %vm339_vm4, %v337_v0 }
 0x245   :  { %351 = dma.vmem_to_hbm [thread:$0]  %s347_s24, 128, %s349_s27, [#allocation3]  }
 0x246   :  { %390 = dma.done.wait [#allocation3], 128  }
 0x247   :  { %391 = vsyncadd [#allocation3], 4294967168 }
 0x248   :  { %356 = vsyncpa [#allocation3], 1 }

</bundles_post_ra>
